<compile_context>
chip_gen: v5e
topology: v5e:2x2
jax: 0.10.0
libtpu: 0.0.40
codegen_flags: <defaults>
</compile_context>

<pallas_src>
import numpy as np
import jax
import jax.numpy as jnp
from jax import lax
from jax.experimental import pallas as pl
from jax.experimental.pallas import tpu as pltpu


# ---------------------------------------------------------------------------
# Host-side (init-time) parameter prep — hoisted out of the forward.
# ---------------------------------------------------------------------------
def coo_to_ell(rows, cols, vals, num_rows):
    """Convert a sparse COO up-transform to padded ELL (cols, vals).

    Padded entries use col=0 / val=0.0, which contribute nothing (exact).
    Duplicate COO entries stay separate and are therefore summed, matching
    torch scatter_add semantics."""
    rows = np.asarray(rows)
    cols = np.asarray(cols)
    vals = np.asarray(vals, dtype=np.float32)
    counts = np.bincount(rows, minlength=num_rows)
    nnz_max = max(int(counts.max()) if counts.size else 1, 1)
    ell_cols = np.zeros((num_rows, nnz_max), np.int32)
    ell_vals = np.zeros((num_rows, nnz_max), np.float32)
    fill = np.zeros(num_rows, np.int32)
    for r, c, v in zip(rows, cols, vals):
        ell_cols[r, fill[r]] = c
        ell_vals[r, fill[r]] = v
        fill[r] += 1
    return jnp.asarray(ell_cols), jnp.asarray(ell_vals)


# ---------------------------------------------------------------------------
# Fused kernel: sparse Pool + spiral gather + Linear + bias + ReLU, per batch.
# ---------------------------------------------------------------------------
def _spiral_deblock_kernel(cols_ref, sidx_ref,          # scalar prefetch (SMEM)
                           x_ref, vals_ref, w_ref, b_ref,   # inputs (VMEM)
                           out_ref,                         # output (VMEM)
                           pooled_ref, gath_ref):           # scratch (VMEM)
    V_out, C_in = pooled_ref.shape
    K = gath_ref.shape[0]
    NNZ = vals_ref.shape[1]

    # --- Stage 1: sparse up-sampling Pool (ELL gather-add on the VPU).
    #     pooled[r, :] = sum_j vals[r, j] * x[cols[r, j], :]
    def pool_row(r, carry):
        vrow = vals_ref[pl.ds(r, 1), :]                    # (1, NNZ)
        acc = jnp.zeros((1, C_in), jnp.float32)
        for j in range(NNZ):                               # static unroll (tiny)
            col = cols_ref[r * NNZ + j]                    # scalar from SMEM
            acc = acc + vrow[:, j:j + 1] * x_ref[0, pl.ds(col, 1), :]
        pooled_ref[pl.ds(r, 1), :] = acc
        return carry

    lax.fori_loop(0, V_out, pool_row, 0)

    # --- Stage 2: spiral row-gather, VMEM -> VMEM (never materialized in HBM).
    def gather_row(r, carry):
        for k in range(K):                                 # static unroll
            idx = sidx_ref[r * K + k]                      # scalar from SMEM
            gath_ref[k, pl.ds(r, 1), :] = pooled_ref[pl.ds(idx, 1), :]
        return carry

    lax.fori_loop(0, V_out, gather_row, 0)

    # --- Stage 3: SpiralConv linear as K accumulated row-vectorized matmuls
    #     out = relu( sum_k gathered_k @ W_k + bias ), fused epilogue.
    acc = jnp.zeros((V_out, out_ref.shape[2]), jnp.float32)
    for k in range(K):                                     # static unroll
        acc = acc + jnp.dot(gath_ref[k], w_ref[k],
                            preferred_element_type=jnp.float32)
    out_ref[0, :, :] = jnp.maximum(acc + b_ref[...], 0.0)


# ---------------------------------------------------------------------------
# Forward wrapper
# ---------------------------------------------------------------------------
def spiral_deblock_forward(x, ell_cols, ell_vals, spiral_indices, weight_k, bias2):
    """x: (B, V_in, C_in) f32
    ell_cols: (V_out, NNZ) int32   up-transform ELL column indices (into V_in)
    ell_vals: (V_out, NNZ) f32     up-transform ELL values (0.0 padding)
    spiral_indices: (V_out, K) int32 into [0, V_out)
    weight_k: (K, C_in, C_out) f32  -- Linear weight, ALREADY transposed and
              reshaped at init (hoisted out of the forward)
    bias2: (1, C_out) f32
    Returns (B, V_out, C_out) f32."""
    B, V_in, C_in = x.shape
    V_out, K = spiral_indices.shape
    NNZ = ell_cols.shape[1]
    C_out = weight_k.shape[2]

    # 1-D SMEM tables (avoid 2-D SMEM padding).
    cols_flat = ell_cols.reshape(-1).astype(jnp.int32)
    sidx_flat = spiral_indices.reshape(-1).astype(jnp.int32)

    grid_spec = pltpu.PrefetchScalarGridSpec(
        num_scalar_prefetch=2,
        grid=(B,),
        in_specs=[
            # All blocks use full array extents in the last two dims -> no padding.
            pl.BlockSpec((1, V_in, C_in), lambda b, cols, sp: (b, 0, 0)),    # x
            pl.BlockSpec((V_out, NNZ), lambda b, cols, sp: (0, 0)),          # ell vals
            pl.BlockSpec((K, C_in, C_out), lambda b, cols, sp: (0, 0, 0)),   # weight
            pl.BlockSpec((1, C_out), lambda b, cols, sp: (0, 0)),            # bias
        ],
        out_specs=pl.BlockSpec((1, V_out, C_out), lambda b, cols, sp: (b, 0, 0)),
        scratch_shapes=[
            pltpu.VMEM((V_out, C_in), jnp.float32),       # pooled (VMEM-resident)
            pltpu.VMEM((K, V_out, C_in), jnp.float32),    # gathered (VMEM-resident)
        ],
    )

    return pl.pallas_call(
        _spiral_deblock_kernel,
        out_shape=jax.ShapeDtypeStruct((B, V_out, C_out), jnp.float32),
        grid_spec=grid_spec,
        compiler_params=pltpu.CompilerParams(
            dimension_semantics=("parallel",)),   # B blocks -> v7x megacore
    )(cols_flat, sidx_flat,
      x.astype(jnp.float32), ell_vals.astype(jnp.float32),
      weight_k.astype(jnp.float32), bias2.astype(jnp.float32))


# ---------------------------------------------------------------------------
# Pure-JAX reference (mirrors the PyTorch module).
# ---------------------------------------------------------------------------
def _reference(x, rows, cols, vals, up_shape, spiral_indices, weight, bias):
    V_out, V_in = up_shape
    u = jnp.zeros((V_out, V_in), jnp.float32).at[rows, cols].add(vals)
    pooled = jnp.einsum('oi,bic->boc', u, x)
    B, _, C_in = x.shape
    K = spiral_indices.shape[1]
    g = pooled[:, spiral_indices.reshape(-1), :].reshape(B, V_out, K * C_in)
    y = g @ weight.T + bias
    return jnp.maximum(y, 0.0)


if __name__ == "__main__":
    # Small shapes consistent with the module:
    B, V_in, V_out = 2, 8, 16          # up_transform upsamples 8 -> 16 vertices
    C_in, C_out, K = 4, 8, 4           # SpiralConv(in=4, out=8, spiral length 4)
    NNZ = 2                            # nonzeros per up-transform row

    key = jax.random.PRNGKey(0)
    k_x, k_val, k_w, k_b, k_idx = jax.random.split(key, 5)

    x = jax.random.normal(k_x, (B, V_in, C_in), jnp.float32)

    # Deterministic sparse up_transform (COO), 2 nonzeros per output row.
    rows = jnp.repeat(jnp.arange(V_out, dtype=jnp.int32), NNZ)
    cols = jnp.stack([jnp.arange(V_out, dtype=jnp.int32) // 2,
                      (jnp.arange(V_out, dtype=jnp.int32) // 2 + 1) % V_in],
                     axis=1).reshape(-1)
    vals = jax.random.uniform(k_val, (V_out * NNZ,), jnp.float32, 0.1, 1.0)

    # Deterministic spiral indices into the upsampled vertex set.
    spiral_indices = jax.random.randint(k_idx, (V_out, K), 0, V_out, jnp.int32)

    # nn.Linear(in_channels * seq_length, out_channels) parameters.
    weight = jax.random.normal(k_w, (C_out, K * C_in), jnp.float32) * 0.1
    bias = jax.random.normal(k_b, (C_out,), jnp.float32) * 0.1

    # ---- parameter prep, done ONCE at init (hoisted out of the forward) ----
    ell_cols, ell_vals = coo_to_ell(rows, cols, vals, V_out)       # sparse pool table
    weight_k = jnp.asarray(weight.T).reshape(K, C_in, C_out)        # (K, C_in, C_out)
    bias2 = jnp.asarray(bias).reshape(1, C_out)

    fwd = jax.jit(spiral_deblock_forward)
    out = fwd(x, ell_cols, ell_vals, spiral_indices, weight_k, bias2)
    out = jax.block_until_ready(out)

    ref = _reference(x, rows, cols, vals, (V_out, V_in),
                     spiral_indices, weight, bias)
    assert out.shape == (B, V_out, C_out)
    assert jnp.allclose(out, ref, atol=1e-5, rtol=1e-5), "mismatch vs reference"
    print("KERNEL_OK")
</pallas_src>

<mosaic_0001>
module attributes {stable_mosaic.version = 11 : i64} {
  func.func @_spiral_deblock_kernel(%arg0: i32, %arg1: memref<32xi32, #tpu.memory_space<smem>>, %arg2: memref<64xi32, #tpu.memory_space<smem>>, %arg3: memref<1x8x4xf32, #tpu.memory_space<vmem>>, %arg4: memref<16x2xf32, #tpu.memory_space<vmem>>, %arg5: memref<4x4x8xf32, #tpu.memory_space<vmem>>, %arg6: memref<1x8xf32, #tpu.memory_space<vmem>>, %arg7: memref<1x16x8xf32, #tpu.memory_space<vmem>>, %arg8: memref<16x4xf32, #tpu.memory_space<vmem>>, %arg9: memref<4x16x4xf32, #tpu.memory_space<vmem>>) attributes {dimension_semantics = [#tpu.dimension_semantics<parallel>], iteration_bounds = array<i64: 2>, scalar_prefetch = 2 : i64, scratch_operands = 2 : i64, tpu.core_type = #tpu.core_type<tc>, window_params = [{transform_indices = @transform_0, window_bounds = array<i64: 1, 8, 4>}, {pipeline_mode = #tpu.pipeline_mode<synchronous>, transform_indices = @transform_1, window_bounds = array<i64: 16, 2>}, {pipeline_mode = #tpu.pipeline_mode<synchronous>, transform_indices = @transform_2, window_bounds = array<i64: 4, 4, 8>}, {pipeline_mode = #tpu.pipeline_mode<synchronous>, transform_indices = @transform_3, window_bounds = array<i64: 1, 8>}, {transform_indices = @transform_4, window_bounds = array<i64: 1, 16, 8>}]} {
    %c0_i32 = arith.constant 0 : i32
    %c16_i32 = arith.constant 16 : i32
    %0 = arith.addi %c0_i32, %c16_i32 : i32
    %c1_i32 = arith.constant 1 : i32
    scf.for %arg10 = %c0_i32 to %0 step %c1_i32  : i32 {
      %35 = arith.index_cast %arg10 : i32 to index
      %c0_35 = arith.constant 0 : index
      %36 = vector.load %arg4[%35, %c0_35] : memref<16x2xf32, #tpu.memory_space<vmem>>, vector<1x2xf32>
      %cst_36 = arith.constant 0.000000e+00 : f32
      %37 = vector.broadcast %cst_36 : f32 to vector<1x4xf32>
      %c2_i32 = arith.constant 2 : i32
      %38 = arith.muli %arg10, %c2_i32 : i32
      %c0_i32_37 = arith.constant 0 : i32
      %39 = arith.addi %38, %c0_i32_37 : i32
      %40 = arith.index_cast %39 : i32 to index
      %41 = memref.load %arg1[%40] : memref<32xi32, #tpu.memory_space<smem>>
      %42 = vector.extract_strided_slice %36 {offsets = [0, 0], sizes = [1, 1], strides = [1, 1]} : vector<1x2xf32> to vector<1x1xf32>
      %c0_38 = arith.constant 0 : index
      %43 = arith.index_cast %41 : i32 to index
      %c0_39 = arith.constant 0 : index
      %44 = vector.load %arg3[%c0_38, %43, %c0_39] : memref<1x8x4xf32, #tpu.memory_space<vmem>>, vector<1x1x4xf32>
      %45 = vector.shape_cast %44 : vector<1x1x4xf32> to vector<1x4xf32>
      %46 = vector.broadcast %42 : vector<1x1xf32> to vector<1x4xf32>
      %47 = arith.mulf %46, %45 : vector<1x4xf32>
      %48 = arith.addf %37, %47 : vector<1x4xf32>
      %c2_i32_40 = arith.constant 2 : i32
      %49 = arith.muli %arg10, %c2_i32_40 : i32
      %c1_i32_41 = arith.constant 1 : i32
      %50 = arith.addi %49, %c1_i32_41 : i32
      %51 = arith.index_cast %50 : i32 to index
      %52 = memref.load %arg1[%51] : memref<32xi32, #tpu.memory_space<smem>>
      %53 = vector.extract_strided_slice %36 {offsets = [0, 1], sizes = [1, 1], strides = [1, 1]} : vector<1x2xf32> to vector<1x1xf32>
      %c0_42 = arith.constant 0 : index
      %54 = arith.index_cast %52 : i32 to index
      %c0_43 = arith.constant 0 : index
      %55 = vector.load %arg3[%c0_42, %54, %c0_43] : memref<1x8x4xf32, #tpu.memory_space<vmem>>, vector<1x1x4xf32>
      %56 = vector.shape_cast %55 : vector<1x1x4xf32> to vector<1x4xf32>
      %57 = vector.broadcast %53 : vector<1x1xf32> to vector<1x4xf32>
      %58 = arith.mulf %57, %56 : vector<1x4xf32>
      %59 = arith.addf %48, %58 : vector<1x4xf32>
      %60 = arith.index_cast %arg10 : i32 to index
      %c0_44 = arith.constant 0 : index
      %61 = vector.load %arg8[%60, %c0_44] : memref<16x4xf32, #tpu.memory_space<vmem>>, vector<1x4xf32>
      tpu.vector_store %arg8[%60, %c0_44], %59 {strides = array<i32>} : memref<16x4xf32, #tpu.memory_space<vmem>>, vector<1x4xf32>,
    }
    %c16_i32_0 = arith.constant 16 : i32
    %c0_i32_1 = arith.constant 0 : i32
    %c16_i32_2 = arith.constant 16 : i32
    %1 = arith.addi %c0_i32_1, %c16_i32_2 : i32
    %c1_i32_3 = arith.constant 1 : i32
    scf.for %arg10 = %c0_i32_1 to %1 step %c1_i32_3  : i32 {
      %c4_i32 = arith.constant 4 : i32
      %35 = arith.muli %arg10, %c4_i32 : i32
      %c0_i32_35 = arith.constant 0 : i32
      %36 = arith.addi %35, %c0_i32_35 : i32
      %37 = arith.index_cast %36 : i32 to index
      %38 = memref.load %arg2[%37] : memref<64xi32, #tpu.memory_space<smem>>
      %39 = arith.index_cast %38 : i32 to index
      %c0_36 = arith.constant 0 : index
      %40 = vector.load %arg8[%39, %c0_36] : memref<16x4xf32, #tpu.memory_space<vmem>>, vector<1x4xf32>
      %c0_37 = arith.constant 0 : index
      %41 = arith.index_cast %arg10 : i32 to index
      %c0_38 = arith.constant 0 : index
      %42 = vector.load %arg9[%c0_37, %41, %c0_38] : memref<4x16x4xf32, #tpu.memory_space<vmem>>, vector<1x1x4xf32>
      %43 = vector.shape_cast %42 : vector<1x1x4xf32> to vector<1x4xf32>
      %44 = vector.shape_cast %40 : vector<1x4xf32> to vector<1x1x4xf32>
      tpu.vector_store %arg9[%c0_37, %41, %c0_38], %44 {strides = array<i32>} : memref<4x16x4xf32, #tpu.memory_space<vmem>>, vector<1x1x4xf32>,
      %c4_i32_39 = arith.constant 4 : i32
      %45 = arith.muli %arg10, %c4_i32_39 : i32
      %c1_i32_40 = arith.constant 1 : i32
      %46 = arith.addi %45, %c1_i32_40 : i32
      %47 = arith.index_cast %46 : i32 to index
      %48 = memref.load %arg2[%47] : memref<64xi32, #tpu.memory_space<smem>>
      %49 = arith.index_cast %48 : i32 to index
      %c0_41 = arith.constant 0 : index
      %50 = vector.load %arg8[%49, %c0_41] : memref<16x4xf32, #tpu.memory_space<vmem>>, vector<1x4xf32>
      %c1_42 = arith.constant 1 : index
      %51 = arith.index_cast %arg10 : i32 to index
      %c0_43 = arith.constant 0 : index
      %52 = vector.load %arg9[%c1_42, %51, %c0_43] : memref<4x16x4xf32, #tpu.memory_space<vmem>>, vector<1x1x4xf32>
      %53 = vector.shape_cast %52 : vector<1x1x4xf32> to vector<1x4xf32>
      %54 = vector.shape_cast %50 : vector<1x4xf32> to vector<1x1x4xf32>
      tpu.vector_store %arg9[%c1_42, %51, %c0_43], %54 {strides = array<i32>} : memref<4x16x4xf32, #tpu.memory_space<vmem>>, vector<1x1x4xf32>,
      %c4_i32_44 = arith.constant 4 : i32
      %55 = arith.muli %arg10, %c4_i32_44 : i32
      %c2_i32 = arith.constant 2 : i32
      %56 = arith.addi %55, %c2_i32 : i32
      %57 = arith.index_cast %56 : i32 to index
      %58 = memref.load %arg2[%57] : memref<64xi32, #tpu.memory_space<smem>>
      %59 = arith.index_cast %58 : i32 to index
      %c0_45 = arith.constant 0 : index
      %60 = vector.load %arg8[%59, %c0_45] : memref<16x4xf32, #tpu.memory_space<vmem>>, vector<1x4xf32>
      %c2_46 = arith.constant 2 : index
      %61 = arith.index_cast %arg10 : i32 to index
      %c0_47 = arith.constant 0 : index
      %62 = vector.load %arg9[%c2_46, %61, %c0_47] : memref<4x16x4xf32, #tpu.memory_space<vmem>>, vector<1x1x4xf32>
      %63 = vector.shape_cast %62 : vector<1x1x4xf32> to vector<1x4xf32>
      %64 = vector.shape_cast %60 : vector<1x4xf32> to vector<1x1x4xf32>
      tpu.vector_store %arg9[%c2_46, %61, %c0_47], %64 {strides = array<i32>} : memref<4x16x4xf32, #tpu.memory_space<vmem>>, vector<1x1x4xf32>,
      %c4_i32_48 = arith.constant 4 : i32
      %65 = arith.muli %arg10, %c4_i32_48 : i32
      %c3_i32 = arith.constant 3 : i32
      %66 = arith.addi %65, %c3_i32 : i32
      %67 = arith.index_cast %66 : i32 to index
      %68 = memref.load %arg2[%67] : memref<64xi32, #tpu.memory_space<smem>>
      %69 = arith.index_cast %68 : i32 to index
      %c0_49 = arith.constant 0 : index
      %70 = vector.load %arg8[%69, %c0_49] : memref<16x4xf32, #tpu.memory_space<vmem>>, vector<1x4xf32>
      %c3_50 = arith.constant 3 : index
      %71 = arith.index_cast %arg10 : i32 to index
      %c0_51 = arith.constant 0 : index
      %72 = vector.load %arg9[%c3_50, %71, %c0_51] : memref<4x16x4xf32, #tpu.memory_space<vmem>>, vector<1x1x4xf32>
      %73 = vector.shape_cast %72 : vector<1x1x4xf32> to vector<1x4xf32>
      %74 = vector.shape_cast %70 : vector<1x4xf32> to vector<1x1x4xf32>
      tpu.vector_store %arg9[%c3_50, %71, %c0_51], %74 {strides = array<i32>} : memref<4x16x4xf32, #tpu.memory_space<vmem>>, vector<1x1x4xf32>,
    }
    %c16_i32_4 = arith.constant 16 : i32
    %cst = arith.constant 0.000000e+00 : f32
    %2 = vector.broadcast %cst : f32 to vector<16x8xf32>
    %c0 = arith.constant 0 : index
    %c0_5 = arith.constant 0 : index
    %c0_6 = arith.constant 0 : index
    %3 = vector.load %arg9[%c0, %c0_5, %c0_6] : memref<4x16x4xf32, #tpu.memory_space<vmem>>, vector<1x16x4xf32>
    %4 = vector.shape_cast %3 : vector<1x16x4xf32> to vector<16x4xf32>
    %c0_7 = arith.constant 0 : index
    %c0_8 = arith.constant 0 : index
    %c0_9 = arith.constant 0 : index
    %5 = vector.load %arg5[%c0_7, %c0_8, %c0_9] : memref<4x4x8xf32, #tpu.memory_space<vmem>>, vector<1x4x8xf32>
    %6 = vector.shape_cast %5 : vector<1x4x8xf32> to vector<4x8xf32>
    %cst_10 = arith.constant dense<0.000000e+00> : vector<16x8xf32>
    %7 = tpu.matmul %4, %6, %cst_10 {dimension_numbers = #tpu.dot_dimension_numbers<[1], [0], [0], [1], [0, 0, 1, 1], [], []>} : vector<16x4xf32>, vector<4x8xf32>, vector<16x8xf32> -> vector<16x8xf32>
    %8 = arith.addf %2, %7 : vector<16x8xf32>
    %c1 = arith.constant 1 : index
    %c0_11 = arith.constant 0 : index
    %c0_12 = arith.constant 0 : index
    %9 = vector.load %arg9[%c1, %c0_11, %c0_12] : memref<4x16x4xf32, #tpu.memory_space<vmem>>, vector<1x16x4xf32>
    %10 = vector.shape_cast %9 : vector<1x16x4xf32> to vector<16x4xf32>
    %c1_13 = arith.constant 1 : index
    %c0_14 = arith.constant 0 : index
    %c0_15 = arith.constant 0 : index
    %11 = vector.load %arg5[%c1_13, %c0_14, %c0_15] : memref<4x4x8xf32, #tpu.memory_space<vmem>>, vector<1x4x8xf32>
    %12 = vector.shape_cast %11 : vector<1x4x8xf32> to vector<4x8xf32>
    %cst_16 = arith.constant dense<0.000000e+00> : vector<16x8xf32>
    %13 = tpu.matmul %10, %12, %cst_16 {dimension_numbers = #tpu.dot_dimension_numbers<[1], [0], [0], [1], [0, 0, 1, 1], [], []>} : vector<16x4xf32>, vector<4x8xf32>, vector<16x8xf32> -> vector<16x8xf32>
    %14 = arith.addf %8, %13 : vector<16x8xf32>
    %c2 = arith.constant 2 : index
    %c0_17 = arith.constant 0 : index
    %c0_18 = arith.constant 0 : index
    %15 = vector.load %arg9[%c2, %c0_17, %c0_18] : memref<4x16x4xf32, #tpu.memory_space<vmem>>, vector<1x16x4xf32>
    %16 = vector.shape_cast %15 : vector<1x16x4xf32> to vector<16x4xf32>
    %c2_19 = arith.constant 2 : index
    %c0_20 = arith.constant 0 : index
    %c0_21 = arith.constant 0 : index
    %17 = vector.load %arg5[%c2_19, %c0_20, %c0_21] : memref<4x4x8xf32, #tpu.memory_space<vmem>>, vector<1x4x8xf32>
    %18 = vector.shape_cast %17 : vector<1x4x8xf32> to vector<4x8xf32>
    %cst_22 = arith.constant dense<0.000000e+00> : vector<16x8xf32>
    %19 = tpu.matmul %16, %18, %cst_22 {dimension_numbers = #tpu.dot_dimension_numbers<[1], [0], [0], [1], [0, 0, 1, 1], [], []>} : vector<16x4xf32>, vector<4x8xf32>, vector<16x8xf32> -> vector<16x8xf32>
    %20 = arith.addf %14, %19 : vector<16x8xf32>
    %c3 = arith.constant 3 : index
    %c0_23 = arith.constant 0 : index
    %c0_24 = arith.constant 0 : index
    %21 = vector.load %arg9[%c3, %c0_23, %c0_24] : memref<4x16x4xf32, #tpu.memory_space<vmem>>, vector<1x16x4xf32>
    %22 = vector.shape_cast %21 : vector<1x16x4xf32> to vector<16x4xf32>
    %c3_25 = arith.constant 3 : index
    %c0_26 = arith.constant 0 : index
    %c0_27 = arith.constant 0 : index
    %23 = vector.load %arg5[%c3_25, %c0_26, %c0_27] : memref<4x4x8xf32, #tpu.memory_space<vmem>>, vector<1x4x8xf32>
    %24 = vector.shape_cast %23 : vector<1x4x8xf32> to vector<4x8xf32>
    %cst_28 = arith.constant dense<0.000000e+00> : vector<16x8xf32>
    %25 = tpu.matmul %22, %24, %cst_28 {dimension_numbers = #tpu.dot_dimension_numbers<[1], [0], [0], [1], [0, 0, 1, 1], [], []>} : vector<16x4xf32>, vector<4x8xf32>, vector<16x8xf32> -> vector<16x8xf32>
    %26 = arith.addf %20, %25 : vector<16x8xf32>
    %c0_29 = arith.constant 0 : index
    %c0_30 = arith.constant 0 : index
    %27 = vector.load %arg6[%c0_29, %c0_30] : memref<1x8xf32, #tpu.memory_space<vmem>>, vector<1x8xf32>
    %28 = vector.broadcast %27 : vector<1x8xf32> to vector<16x8xf32>
    %29 = arith.addf %26, %28 : vector<16x8xf32>
    %cst_31 = arith.constant 0.000000e+00 : f32
    %30 = vector.broadcast %cst_31 : f32 to vector<16x8xf32>
    %31 = arith.maximumf %29, %30 : vector<16x8xf32>
    %c0_32 = arith.constant 0 : index
    %c0_33 = arith.constant 0 : index
    %c0_34 = arith.constant 0 : index
    %32 = vector.load %arg7[%c0_32, %c0_33, %c0_34] : memref<1x16x8xf32, #tpu.memory_space<vmem>>, vector<1x16x8xf32>
    %33 = vector.shape_cast %32 : vector<1x16x8xf32> to vector<16x8xf32>
    %34 = vector.shape_cast %31 : vector<16x8xf32> to vector<1x16x8xf32>
    tpu.vector_store %arg7[%c0_32, %c0_33, %c0_34], %34 {strides = array<i32>} : memref<1x16x8xf32, #tpu.memory_space<vmem>>, vector<1x16x8xf32>,
    return
  }
  func.func @transform_0(%arg0: i32, %arg1: memref<32xi32, #tpu.memory_space<smem>>, %arg2: memref<64xi32, #tpu.memory_space<smem>>) -> (i32, i32, i32) {
    %c0_i32 = arith.constant 0 : i32
    %c0_i32_0 = arith.constant 0 : i32
    %c0_i32_1 = arith.constant 0 : i32
    return %arg0, %c0_i32, %c0_i32_0 : i32, i32, i32
  }
  func.func @transform_1(%arg0: i32, %arg1: memref<32xi32, #tpu.memory_space<smem>>, %arg2: memref<64xi32, #tpu.memory_space<smem>>) -> (i32, i32) {
    %c0_i32 = arith.constant 0 : i32
    %c0_i32_0 = arith.constant 0 : i32
    %c0_i32_1 = arith.constant 0 : i32
    return %c0_i32, %c0_i32_0 : i32, i32
  }
  func.func @transform_2(%arg0: i32, %arg1: memref<32xi32, #tpu.memory_space<smem>>, %arg2: memref<64xi32, #tpu.memory_space<smem>>) -> (i32, i32, i32) {
    %c0_i32 = arith.constant 0 : i32
    %c0_i32_0 = arith.constant 0 : i32
    %c0_i32_1 = arith.constant 0 : i32
    %c0_i32_2 = arith.constant 0 : i32
    return %c0_i32, %c0_i32_0, %c0_i32_1 : i32, i32, i32
  }
  func.func @transform_3(%arg0: i32, %arg1: memref<32xi32, #tpu.memory_space<smem>>, %arg2: memref<64xi32, #tpu.memory_space<smem>>) -> (i32, i32) {
    %c0_i32 = arith.constant 0 : i32
    %c0_i32_0 = arith.constant 0 : i32
    %c0_i32_1 = arith.constant 0 : i32
    return %c0_i32, %c0_i32_0 : i32, i32
  }
  func.func @transform_4(%arg0: i32, %arg1: memref<32xi32, #tpu.memory_space<smem>>, %arg2: memref<64xi32, #tpu.memory_space<smem>>) -> (i32, i32, i32) {
    %c0_i32 = arith.constant 0 : i32
    %c0_i32_0 = arith.constant 0 : i32
    %c0_i32_1 = arith.constant 0 : i32
    return %arg0, %c0_i32, %c0_i32_0 : i32, i32, i32
  }
}

</mosaic_0001>

<bundles_post_ra>
// kernel: spiral_deblock_forward.1
= control target key start
LH: loop header
LB: loop body
LE: loop exit
PB: predicated region body
PF: predicated region fallthrough
CT: control target
= control target key end

     0   :  { %s631_s27 = smov [#allocation5]   ;;  %s632_s28 = smov [#allocation6]   ;;  %s737_s0 = inlined_call_operand.vmem [shape: s32[32], index: 0, kind: input, shape index: {}]   ;;  %s738_s2 = inlined_call_operand.vmem [shape: f32[2,8,4], index: 2, kind: input, shape index: {}]   ;;  %s739_s3 = inlined_call_operand.vmem [shape: f32[16,2], index: 3, kind: input, shape index: {}]   ;;  %s740_s4 = inlined_call_operand.vmem [shape: f32[4,4,8], index: 4, kind: input, shape index: {}]   ;;  %s741_s5 = inlined_call_operand.vmem [shape: f32[1,8], index: 5, kind: input, shape index: {}]   ;;  %s742_s6 = inlined_call_operand.vmem [shape: f32[2,16,8], index: 6, kind: output, shape index: {}]   ;;  %s743_s1 = inlined_call_operand.vmem [shape: s32[64], index: 1, kind: input, shape index: {}]  }
   0x1   :  { %s12_s23 = sshll.u32 %s737_s0, 4  ;;  %s17_s26 = sshll.u32 %s743_s1, 4  ;;  %s13_s23 = int_to_ptr.vmem [resolvable:$true] %s12_s23  ;;  %s18_s26 = int_to_ptr.vmem [resolvable:$true] %s17_s26 }
   0x2   :  { %15 = dma.vmem_to_smem %s13_s23, 16, %s631_s27, [#allocation4] }
   0x3   :  { %20 = dma.vmem_to_smem %s18_s26, 16, %s632_s28, [#allocation4] }
   0x4   :  { %617 = dma.done.wait [#allocation4], 32 }
   0x5   :  { %618 = vsyncadd [#allocation4], 4294967264 }
   0x6   :  { %23 = sfence }
   0x7   :  { %s676_s29 = smov 0  }
   0x8 LB: > { %s519_s0 = sadd.s32 4294967295, %s621_s29   ;;  %p523_p0 = scmp.ge.s32.totalorder %s621_s29, 1  ;;  %s621_s29 = sphi %s676_s29, %s29_s29  }
   0x9   : > { %p176_p1 = scmp.lt.s32.totalorder %s621_s29, 3 }
   0xb   : > { %p177_p2 = pnand %p523_p0, %p176_p1 }
   0xc   : > { %p201_p3 = scmp.lt.s32.totalorder (!%p177_p2), %s519_s0, 1  ;;  %s694_s13 = smov (!%p177_p2), 0  }
   0xd   : > { %180 = sbr.rel (%p177_p2) target bundleno = 321 (0x141), region = 36 }
  0x12   : > { %s745_s0 = smov (!%p201_p3, %s519_s0), 1 }
  0x13   : > { %s524_s1 = sshll.u32 %s745_s0, 3  ;;  %s549_s30 = sshll.u32 %s745_s0, 4 }
  0x14   : > { %s687_s9 = scalar_lea.vmem %s738_s2, %s524_s1  ;;  %s692_s12 = scalar_lea.vmem %s742_s6, %s549_s30 }
  0x15 LB: >> { %v633_v0 = vmov 0   ;;  %s216_s16 = scalar_lea.vmem %s739_s3, %s625_s13  ;;  %v634_v2 = vmov 1   ;;  %s527_s17 = sshll.u32 %s625_s13, 1  ;;  %vm240_vm0 = vcmask 24576   ;;  %s625_s13 = sphi %s694_s13, %s215_s13  }
  0x16   : >> { %578 = vset.pattern.permute.xlu0 %v633_v0  ;;  %v217_v1 = vld [vmem:[%s216_s16] sm:$0x1]  ;;  %s229_s18 = sadd.s32 1, %s527_s17  ;;  %s219_s19 = sld [smem:[#allocation5 + %s527_s17]] }
  0x17   : >> { %224 = vperm.xlu0 %578, %v217_v1   ;;  %s230_s20 = sld [smem:[#allocation5 + %s229_s18]]  ;;  %s239_s23 = scalar_lea.vmem [#allocation2], %s625_s13 }
  0x18   : >> { %s215_s13 = sadd.s32 1, %s625_s13  }
  0x19   : >> { %p212_p4 = scmp.ge.s32.totalorder %s215_s13, 16  }
  0x1a   : > { %s627_s24 = smov (%p212_p4), 0  }
  0x1c   : >> { %s220_s21 = scalar_lea.vmem %s687_s9, %s219_s19 }
  0x1d   : >> { %s231_s22 = scalar_lea.vmem %s687_s9, %s230_s20  ;;  %v221_v4 = vld [vmem:[%s220_s21] sm:$0x1] }
  0x1e   : >> { %v232_v5 = vld [vmem:[%s231_s22] sm:$0x1] }
  0x1f   : >> { %579 = vset.pattern.permute.xlu0 %v634_v2 }
  0x20   : >> { %234 = vperm.xlu0 %579, %v217_v1  }
  0x89   : >> { %v225_v3 = vpop.permute.xlu0 %224 }
  0x8a   : >> { %v227_v7 = vmul.f32 %v225_v3, %v221_v4 }
  0x92   : >> { %v235_v6 = vpop.permute.xlu0 %234 }
  0x93   : >> { %v237_v8 = vmul.f32 %v235_v6, %v232_v5  ;;  %214 = sbr.rel (!%p212_p4) target bundleno = 21 (0x15), region = 98 }
  0x95   : >> { %v238_v9 = vadd.f32 %v237_v8, %v227_v7 }
  0x97   : >> { %241 = vst.msk [vmem:[%s239_s23] sm:$0x1] %vm240_vm0, %v238_v9 }
  0x98 LB: >> { %s528_s25 = sshll.u32 %s629_s24, 2  ;;  %s252_s10 = scalar_lea.vmem [#allocation3], %s629_s24  ;;  %s629_s24 = sphi %s627_s24, %s247_s24  }
  0x99   : >> { %s249_s26 = sld [smem:[#allocation6 + %s528_s25]]  ;;  %s255_s27 = sadd.s32 1, %s528_s25 }
  0x9a   : >> { %s256_s28 = sld [smem:[#allocation6 + %s255_s27]]  ;;  %s262_s0 = sadd.s32 2, %s528_s25 }
  0x9b   : >> { %s263_s1 = sld [smem:[#allocation6 + %s262_s0]]  ;;  %s269_s30 = sadd.s32 3, %s528_s25 }
  0x9c   : >> { %s270_s7 = sld [smem:[#allocation6 + %s269_s30]]  ;;  %s247_s24 = sadd.s32 1, %s629_s24  }
  0x9d   : >> { %p244_p5 = scmp.ge.s32.totalorder %s247_s24, 16  }
  0x9e   : > { %vm291_vm1 = vcmask (%p244_p5), 1043456   ;;  %v539_v14 = vld [vmem:[%s740_s4 + $0x8] sm:$0xf] (%p244_p5)  ;;  %vm284_vm2 = vcmask (%p244_p5), 31744   ;;  %v543_v17 = vld [vmem:[%s740_s4 + $0xc] sm:$0xf] (%p244_p5) }
  0x9f   : >> { %s250_s8 = scalar_lea.vmem [#allocation2], %s249_s26  ;;  %540 = vmatpush.msk.msra.mxu2 (%p244_p5), %vm291_vm1, %v539_v14  ;;  %v532_v18 = vld [vmem:[%s740_s4 + $0x4] sm:$0xf] (%p244_p5)  ;;  %v278_v19 = vld [vmem:[%s740_s4] sm:$0xf] (%p244_p5)  ;;  %544 = vmatpush.msk.msra.mxu3 (%p244_p5), %vm291_vm1, %v543_v17  ;;  %vm436_vm3 = vcmask (%p244_p5), 64512  }
  0xa0   : >> { %v251_v10 = vld [vmem:[%s250_s8] sm:$0x1]  ;;  %s257_s11 = scalar_lea.vmem [#allocation2], %s256_s28  ;;  %246 = sbr.rel (!%p244_p5) target bundleno = 152 (0x98), region = 109  ;;  %533 = vmatpush.msk.msra.mxu0 (%p244_p5), %vm291_vm1, %v532_v18  ;;  %536 = vmatpush.msk.msra.mxu1 (%p244_p5), %vm291_vm1, %v278_v19 }
  0xa1   : >> { %254 = vst.msk [vmem:[%s252_s10] sm:$0x1] %vm240_vm0, %v251_v10  ;;  %v258_v11 = vld [vmem:[%s257_s11] sm:$0x1]  ;;  %s264_s9 = scalar_lea.vmem [#allocation2], %s263_s1 }
  0xa2   : >> { %529 = vst.msk [vmem:[%s252_s10 + $0x10] sm:$0x1] %vm240_vm0, %v258_v11  ;;  %v265_v12 = vld [vmem:[%s264_s9] sm:$0x1]  ;;  %s271_s13 = scalar_lea.vmem [#allocation2], %s270_s7 }
  0xa3   : >> { %530 = vst.msk [vmem:[%s252_s10 + $0x20] sm:$0x1] %vm240_vm0, %v265_v12  ;;  %v272_v13 = vld [vmem:[%s271_s13] sm:$0x1] }
  0xa4   : >> { %531 = vst.msk [vmem:[%s252_s10 + $0x30] sm:$0x1] %vm240_vm0, %v272_v13  ;;  %v580_v32 = vld [vmem:[%s741_s5] ss:$0 sm:$0xff] (%p244_p5) }
  0xab   : > { %v351_v15 = vld [vmem:[#allocation3 + $0x20] sm:$0xff]  ;;  %v390_v16 = vld [vmem:[#allocation3 + $0x30] sm:$0xff]  ;;  %v352_v22 = vld [vmem:[#allocation3 + $0x28] sm:$0xff] }
  0xac   : > { %541 = vmatmul.msk.f32.vlgmr.msra.gmra.mxu2 %vm284_vm2, %v351_v15  ;;  %v280_v20 = vld [vmem:[#allocation3 + $0x10] sm:$0xff]  ;;  %v276_v21 = vld [vmem:[#allocation3] sm:$0xff]  ;;  %545 = vmatmul.msk.f32.vlgmr.msra.gmra.mxu3 %vm284_vm2, %v390_v16  ;;  %v391_v23 = vld [vmem:[#allocation3 + $0x38] sm:$0xff] }
  0xad   : > { %534 = vmatmul.msk.f32.vlgmr.msra.gmra.mxu0 %vm284_vm2, %v280_v20  ;;  %537 = vmatmul.msk.f32.vlgmr.msra.gmra.mxu1 %vm284_vm2, %v276_v21  ;;  %v281_v24 = vld [vmem:[#allocation3 + $0x18] sm:$0xff]  ;;  %v277_v25 = vld [vmem:[#allocation3 + $0x8] sm:$0xff] }
  0xb4   : > { %542 = vmatmul.msk.f32.gmra.mxu2 %vm284_vm2, %v352_v22  ;;  %546 = vmatmul.msk.f32.gmra.mxu3 %vm284_vm2, %v391_v23 }
  0xb5   : > { %535 = vmatmul.msk.f32.gmra.mxu0 %vm284_vm2, %v281_v24  ;;  %538 = vmatmul.msk.f32.gmra.mxu1 %vm284_vm2, %v277_v25 }
 0x12a   : > { %v312_v26 = vpop.f32.mrf.mxu0  ;;  %v344_v27 = vpop.f32.mrf.mxu1 }
 0x12b   : > { %v345_v28 = vadd.f32 %v344_v27, %v312_v26 }
 0x12f   : > { %v381_v29 = vpop.f32.mrf.mxu2  ;;  %v420_v31 = vpop.f32.mrf.mxu3 }
 0x130   : > { %v387_v30 = vadd.f32 %v381_v29, %v345_v28 }
 0x132   : > { %v426_v33 = vadd.f32 %v420_v31, %v387_v30  ;;  %v315_v34 = vpop.f32.mrf.mxu0  ;;  %v347_v36 = vpop.f32.mrf.mxu1 }
 0x133   : > { %v348_v37 = vadd.f32 %v347_v36, %v315_v34 }
 0x134   : > { %v432_v35 = vadd.f32 %v580_v32, %v426_v33 }
 0x136   : > { %v434_v38 = vmax.f32 %v432_v35, 0.0 }
 0x137   : > { %v384_v39 = vpop.f32.mrf.mxu2  ;;  %v423_v41 = vpop.f32.mrf.mxu3 }
 0x138   : > { %437 = vst.msk [vmem:[%s692_s12] sm:$0xff] %vm436_vm3, %v434_v38  ;;  %v388_v40 = vadd.f32 %v384_v39, %v348_v37 }
 0x13a   : > { %v427_v42 = vadd.f32 %v423_v41, %v388_v40 }
 0x13c   : > { %v433_v43 = vadd.f32 %v580_v32, %v427_v42 }
 0x13e   : > { %v435_v44 = vmax.f32 %v433_v43, 0.0 }
 0x140   : > { %438 = vst.msk [vmem:[%s692_s12 + $0x8] sm:$0xff] %vm436_vm3, %v435_v44 }
 0x141 PF: > { %s29_s29 = sadd.s32 1, %s621_s29  }
 0x142   : > { %p26_p6 = scmp.ge.s32.totalorder %s29_s29, 4  }
 0x144   :  { %28 = sbr.rel (!%p26_p6) target bundleno = 8 (0x8), region = 120 }

</bundles_post_ra>
